<compile_context>
chip_gen: v7x
topology: tpu7x:2x2x1
jax: 0.10.0
libtpu: 0.0.40
codegen_flags: <defaults>
</compile_context>

<pallas_src>
import functools

import jax
import jax.numpy as jnp
from jax.experimental import pallas as pl
from jax.experimental.pallas import tpu as pltpu


def nbeats_kernel(x_ref, w1_ref, b1_ref, w2_ref, b2_ref, w3_ref, b3_ref,
                  w4_ref, b4_ref, o_ref):
    # Activations cast to bf16 for the MXU; accumulation + epilogue in f32.
    x = x_ref[...].astype(jnp.bfloat16)

    h = jnp.dot(x, w1_ref[...], preferred_element_type=jnp.float32) + b1_ref[...]
    h = jnp.maximum(h, 0.0).astype(jnp.bfloat16)

    h = jnp.dot(h, w2_ref[...], preferred_element_type=jnp.float32) + b2_ref[...]
    h = jnp.maximum(h, 0.0).astype(jnp.bfloat16)

    h = jnp.dot(h, w3_ref[...], preferred_element_type=jnp.float32) + b3_ref[...]
    h = jnp.maximum(h, 0.0).astype(jnp.bfloat16)

    # Final layer already has the TrendBasis folded in: [B, H] @ [H, Fp] + [1, Fp]
    out = jnp.dot(h, w4_ref[...], preferred_element_type=jnp.float32) + b4_ref[...]
    o_ref[...] = out.astype(o_ref.dtype)


def nbeats_forward(x, params, basis, *, batch_tile=None):
    (w1, b1, w2, b2, w3, b3, w4, b4) = params
    B, in_size = x.shape
    H = w1.shape[1]
    degree, F = basis.shape
    assert w4.shape == (H, degree) and basis.shape[0] == degree

    # --- host-side algebraic folding of TrendBasis into fc4 ------------------
    w4_fold = w4.astype(jnp.float32) @ basis          # [H, F]
    b4_fold = b4.astype(jnp.float32) @ basis          # [1, F]

    # Pad forecast dim to a lane-dense multiple of 128 (zero columns); the
    # wrapper slices the padding away after the call.
    Fp = max(128, ((F + 127) // 128) * 128)
    w4_p = jnp.zeros((H, Fp), jnp.float32).at[:, :F].set(w4_fold)
    b4_p = jnp.zeros((1, Fp), jnp.float32).at[:, :F].set(b4_fold)

    # bf16 weights (halves weight DMA + vreg footprint); f32 biases.
    w1b = w1.astype(jnp.bfloat16)
    w2b = w2.astype(jnp.bfloat16)
    w3b = w3.astype(jnp.bfloat16)
    w4b = w4_p.astype(jnp.bfloat16)

    # --- batch grid -----------------------------------------------------------
    if batch_tile is None:
        batch_tile = 256 if (B % 256 == 0) else B
    assert B % batch_tile == 0, "batch must be divisible by batch_tile"
    nb = B // batch_tile

    # Weights / biases: resident across the batch grid (constant index_map).
    resident = lambda a: pl.BlockSpec(a.shape, lambda i: (0, 0))
    x_spec = pl.BlockSpec((batch_tile, in_size), lambda i: (i, 0))
    out_spec = pl.BlockSpec((batch_tile, Fp), lambda i: (i, 0))

    flops = 2 * B * (in_size * H + 2 * H * H + H * Fp)
    bytes_accessed = (
        x.size * x.dtype.itemsize
        + w1b.size * 2 + w2b.size * 2 + w3b.size * 2 + w4b.size * 2
        + b1.size * 4 + b2.size * 4 + b3.size * 4 + b4_p.size * 4
        + B * Fp * 4
    )

    out_padded = pl.pallas_call(
        nbeats_kernel,
        out_shape=jax.ShapeDtypeStruct((B, Fp), jnp.float32),
        grid=(nb,),
        in_specs=[x_spec,
                  resident(w1b), resident(b1),
                  resident(w2b), resident(b2),
                  resident(w3b), resident(b3),
                  resident(w4b), resident(b4_p)],
        out_specs=out_spec,
        compiler_params=pltpu.CompilerParams(
            dimension_semantics=("parallel",)),
        cost_estimate=pl.CostEstimate(
            flops=flops, transcendentals=0, bytes_accessed=bytes_accessed),
    )(x, w1b, b1, w2b, b2, w3b, b3, w4b, b4_p)

    return out_padded[:, :F]


def init_params(key, input_size, hidden_size, degree):
    """Deterministic init matching PyTorch nn.Linear shapes.

    PyTorch stores weight as [out, in]; we store the transpose [in, out] so the
    kernel computes x @ W + b (identical math to x @ weight.T + b)."""
    ks = jax.random.split(key, 8)

    def linear(kw, kb, fan_in, fan_out):
        bound = 1.0 / jnp.sqrt(fan_in)
        w = jax.random.uniform(kw, (fan_in, fan_out), jnp.float32, -bound, bound)
        b = jax.random.uniform(kb, (fan_out,), jnp.float32, -bound, bound)
        return w, b.reshape(1, fan_out)  # 2-D bias for clean broadcasting

    w1, b1 = linear(ks[0], ks[1], input_size, hidden_size)
    w2, b2 = linear(ks[2], ks[3], hidden_size, hidden_size)
    w3, b3 = linear(ks[4], ks[5], hidden_size, hidden_size)
    w4, b4 = linear(ks[6], ks[7], hidden_size, degree)
    return (w1, b1, w2, b2, w3, b3, w4, b4)


def make_trend_basis(degree, forecast_length):
    t = jnp.linspace(-1.0, 1.0, forecast_length)
    return jnp.stack([t ** i for i in range(degree)], axis=0)  # [degree, F]


def reference_forward_f32(x, params, basis):
    """Pure-f32 reference matching the PyTorch module exactly."""
    (w1, b1, w2, b2, w3, b3, w4, b4) = params
    h = jax.nn.relu(x @ w1 + b1)
    h = jax.nn.relu(h @ w2 + b2)
    h = jax.nn.relu(h @ w3 + b3)
    theta = h @ w4 + b4
    return theta @ basis


def reference_forward_bf16(x, params, basis):
    """Mixed-precision reference mimicking the kernel's bf16 operands + folded basis."""
    (w1, b1, w2, b2, w3, b3, w4, b4) = params
    w4_fold = (w4.astype(jnp.float32) @ basis)
    b4_fold = (b4.astype(jnp.float32) @ basis)
    dot = functools.partial(jnp.dot, preferred_element_type=jnp.float32)
    h = jax.nn.relu(dot(x.astype(jnp.bfloat16), w1.astype(jnp.bfloat16)) + b1)
    h = jax.nn.relu(dot(h.astype(jnp.bfloat16), w2.astype(jnp.bfloat16)) + b2)
    h = jax.nn.relu(dot(h.astype(jnp.bfloat16), w3.astype(jnp.bfloat16)) + b3)
    return dot(h.astype(jnp.bfloat16), w4_fold.astype(jnp.bfloat16)) + b4_fold


if __name__ == "__main__":
    # Shapes consistent with NBeatsModel(input_size, forecast_length,
    # hidden_size=128, degree=3) — hidden_size is the PyTorch default (and
    # lane-exact on TPU).
    batch = 8
    input_size = 16
    forecast_length = 16
    hidden_size = 128
    degree = 3

    key = jax.random.PRNGKey(0)
    k_x, k_p = jax.random.split(key)

    x = jax.random.normal(k_x, (batch, input_size), dtype=jnp.float32)
    params = init_params(k_p, input_size, hidden_size, degree)
    basis = make_trend_basis(degree, forecast_length)

    out = nbeats_forward(x, params, basis)
    out = jax.block_until_ready(out)
    assert out.shape == (batch, forecast_length)

    # Tight check vs. a reference using the same bf16 operand precision.
    ref_bf16 = reference_forward_bf16(x, params, basis)
    assert jnp.allclose(out, ref_bf16, atol=2e-3, rtol=2e-3), "mismatch vs bf16 reference"

    # Loose check vs. the exact f32 PyTorch-equivalent math (bf16 weight rounding).
    ref_f32 = reference_forward_f32(x, params, basis)
    assert jnp.allclose(out, ref_f32, atol=5e-2, rtol=5e-2), "mismatch vs f32 reference"

    print("KERNEL_OK")
</pallas_src>

<mosaic_0001>
module attributes {stable_mosaic.version = 11 : i64} {
  func.func @nbeats_kernel(%arg0: i32, %arg1: memref<8x16xf32, #tpu.memory_space<vmem>>, %arg2: memref<16x128xbf16, #tpu.memory_space<vmem>>, %arg3: memref<1x128xf32, #tpu.memory_space<vmem>>, %arg4: memref<128x128xbf16, #tpu.memory_space<vmem>>, %arg5: memref<1x128xf32, #tpu.memory_space<vmem>>, %arg6: memref<128x128xbf16, #tpu.memory_space<vmem>>, %arg7: memref<1x128xf32, #tpu.memory_space<vmem>>, %arg8: memref<128x128xbf16, #tpu.memory_space<vmem>>, %arg9: memref<1x128xf32, #tpu.memory_space<vmem>>, %arg10: memref<8x128xf32, #tpu.memory_space<vmem>>) attributes {dimension_semantics = [#tpu.dimension_semantics<parallel>], iteration_bounds = array<i64: 1>, scalar_prefetch = 0 : i64, scratch_operands = 0 : i64, tpu.core_type = #tpu.core_type<tc>, window_params = [{transform_indices = @transform_0, window_bounds = array<i64: 8, 16>}, {pipeline_mode = #tpu.pipeline_mode<synchronous>, transform_indices = @transform_1, window_bounds = array<i64: 16, 128>}, {pipeline_mode = #tpu.pipeline_mode<synchronous>, transform_indices = @transform_2, window_bounds = array<i64: 1, 128>}, {pipeline_mode = #tpu.pipeline_mode<synchronous>, transform_indices = @transform_3, window_bounds = array<i64: 128, 128>}, {pipeline_mode = #tpu.pipeline_mode<synchronous>, transform_indices = @transform_4, window_bounds = array<i64: 1, 128>}, {pipeline_mode = #tpu.pipeline_mode<synchronous>, transform_indices = @transform_5, window_bounds = array<i64: 128, 128>}, {pipeline_mode = #tpu.pipeline_mode<synchronous>, transform_indices = @transform_6, window_bounds = array<i64: 1, 128>}, {pipeline_mode = #tpu.pipeline_mode<synchronous>, transform_indices = @transform_7, window_bounds = array<i64: 128, 128>}, {pipeline_mode = #tpu.pipeline_mode<synchronous>, transform_indices = @transform_8, window_bounds = array<i64: 1, 128>}, {transform_indices = @transform_9, window_bounds = array<i64: 8, 128>}]} {
    %c0 = arith.constant 0 : index
    %c0_0 = arith.constant 0 : index
    %0 = vector.load %arg1[%c0, %c0_0] : memref<8x16xf32, #tpu.memory_space<vmem>>, vector<8x16xf32>
    %1 = arith.truncf %0 : vector<8x16xf32> to vector<8x16xbf16>
    %c0_1 = arith.constant 0 : index
    %c0_2 = arith.constant 0 : index
    %2 = vector.load %arg2[%c0_1, %c0_2] : memref<16x128xbf16, #tpu.memory_space<vmem>>, vector<16x128xbf16>
    %cst = arith.constant dense<0.000000e+00> : vector<8x128xf32>
    %3 = tpu.matmul %1, %2, %cst {dimension_numbers = #tpu.dot_dimension_numbers<[1], [0], [0], [1], [0, 0, 1, 1], [], []>} : vector<8x16xbf16>, vector<16x128xbf16>, vector<8x128xf32> -> vector<8x128xf32>
    %c0_3 = arith.constant 0 : index
    %c0_4 = arith.constant 0 : index
    %4 = vector.load %arg3[%c0_3, %c0_4] : memref<1x128xf32, #tpu.memory_space<vmem>>, vector<1x128xf32>
    %5 = vector.broadcast %4 : vector<1x128xf32> to vector<8x128xf32>
    %6 = arith.addf %3, %5 : vector<8x128xf32>
    %cst_5 = arith.constant 0.000000e+00 : f32
    %7 = vector.broadcast %cst_5 : f32 to vector<8x128xf32>
    %8 = arith.maximumf %6, %7 : vector<8x128xf32>
    %9 = arith.truncf %8 : vector<8x128xf32> to vector<8x128xbf16>
    %c0_6 = arith.constant 0 : index
    %c0_7 = arith.constant 0 : index
    %10 = vector.load %arg4[%c0_6, %c0_7] : memref<128x128xbf16, #tpu.memory_space<vmem>>, vector<128x128xbf16>
    %cst_8 = arith.constant dense<0.000000e+00> : vector<8x128xf32>
    %11 = tpu.matmul %9, %10, %cst_8 {dimension_numbers = #tpu.dot_dimension_numbers<[1], [0], [0], [1], [0, 0, 1, 1], [], []>} : vector<8x128xbf16>, vector<128x128xbf16>, vector<8x128xf32> -> vector<8x128xf32>
    %c0_9 = arith.constant 0 : index
    %c0_10 = arith.constant 0 : index
    %12 = vector.load %arg5[%c0_9, %c0_10] : memref<1x128xf32, #tpu.memory_space<vmem>>, vector<1x128xf32>
    %13 = vector.broadcast %12 : vector<1x128xf32> to vector<8x128xf32>
    %14 = arith.addf %11, %13 : vector<8x128xf32>
    %cst_11 = arith.constant 0.000000e+00 : f32
    %15 = vector.broadcast %cst_11 : f32 to vector<8x128xf32>
    %16 = arith.maximumf %14, %15 : vector<8x128xf32>
    %17 = arith.truncf %16 : vector<8x128xf32> to vector<8x128xbf16>
    %c0_12 = arith.constant 0 : index
    %c0_13 = arith.constant 0 : index
    %18 = vector.load %arg6[%c0_12, %c0_13] : memref<128x128xbf16, #tpu.memory_space<vmem>>, vector<128x128xbf16>
    %cst_14 = arith.constant dense<0.000000e+00> : vector<8x128xf32>
    %19 = tpu.matmul %17, %18, %cst_14 {dimension_numbers = #tpu.dot_dimension_numbers<[1], [0], [0], [1], [0, 0, 1, 1], [], []>} : vector<8x128xbf16>, vector<128x128xbf16>, vector<8x128xf32> -> vector<8x128xf32>
    %c0_15 = arith.constant 0 : index
    %c0_16 = arith.constant 0 : index
    %20 = vector.load %arg7[%c0_15, %c0_16] : memref<1x128xf32, #tpu.memory_space<vmem>>, vector<1x128xf32>
    %21 = vector.broadcast %20 : vector<1x128xf32> to vector<8x128xf32>
    %22 = arith.addf %19, %21 : vector<8x128xf32>
    %cst_17 = arith.constant 0.000000e+00 : f32
    %23 = vector.broadcast %cst_17 : f32 to vector<8x128xf32>
    %24 = arith.maximumf %22, %23 : vector<8x128xf32>
    %25 = arith.truncf %24 : vector<8x128xf32> to vector<8x128xbf16>
    %c0_18 = arith.constant 0 : index
    %c0_19 = arith.constant 0 : index
    %26 = vector.load %arg8[%c0_18, %c0_19] : memref<128x128xbf16, #tpu.memory_space<vmem>>, vector<128x128xbf16>
    %cst_20 = arith.constant dense<0.000000e+00> : vector<8x128xf32>
    %27 = tpu.matmul %25, %26, %cst_20 {dimension_numbers = #tpu.dot_dimension_numbers<[1], [0], [0], [1], [0, 0, 1, 1], [], []>} : vector<8x128xbf16>, vector<128x128xbf16>, vector<8x128xf32> -> vector<8x128xf32>
    %c0_21 = arith.constant 0 : index
    %c0_22 = arith.constant 0 : index
    %28 = vector.load %arg9[%c0_21, %c0_22] : memref<1x128xf32, #tpu.memory_space<vmem>>, vector<1x128xf32>
    %29 = vector.broadcast %28 : vector<1x128xf32> to vector<8x128xf32>
    %30 = arith.addf %27, %29 : vector<8x128xf32>
    %c0_23 = arith.constant 0 : index
    %c0_24 = arith.constant 0 : index
    %31 = vector.load %arg10[%c0_23, %c0_24] : memref<8x128xf32, #tpu.memory_space<vmem>>, vector<8x128xf32>
    tpu.vector_store %arg10[%c0_23, %c0_24], %30 {strides = array<i32>} : memref<8x128xf32, #tpu.memory_space<vmem>>, vector<8x128xf32>,
    return
  }
  func.func @transform_0(%arg0: i32) -> (i32, i32) {
    %c0_i32 = arith.constant 0 : i32
    %c0_i32_0 = arith.constant 0 : i32
    return %arg0, %c0_i32 : i32, i32
  }
  func.func @transform_1(%arg0: i32) -> (i32, i32) {
    %c0_i32 = arith.constant 0 : i32
    %c0_i32_0 = arith.constant 0 : i32
    %c0_i32_1 = arith.constant 0 : i32
    return %c0_i32, %c0_i32_0 : i32, i32
  }
  func.func @transform_2(%arg0: i32) -> (i32, i32) {
    %c0_i32 = arith.constant 0 : i32
    %c0_i32_0 = arith.constant 0 : i32
    %c0_i32_1 = arith.constant 0 : i32
    return %c0_i32, %c0_i32_0 : i32, i32
  }
  func.func @transform_3(%arg0: i32) -> (i32, i32) {
    %c0_i32 = arith.constant 0 : i32
    %c0_i32_0 = arith.constant 0 : i32
    %c0_i32_1 = arith.constant 0 : i32
    return %c0_i32, %c0_i32_0 : i32, i32
  }
  func.func @transform_4(%arg0: i32) -> (i32, i32) {
    %c0_i32 = arith.constant 0 : i32
    %c0_i32_0 = arith.constant 0 : i32
    %c0_i32_1 = arith.constant 0 : i32
    return %c0_i32, %c0_i32_0 : i32, i32
  }
  func.func @transform_5(%arg0: i32) -> (i32, i32) {
    %c0_i32 = arith.constant 0 : i32
    %c0_i32_0 = arith.constant 0 : i32
    %c0_i32_1 = arith.constant 0 : i32
    return %c0_i32, %c0_i32_0 : i32, i32
  }
  func.func @transform_6(%arg0: i32) -> (i32, i32) {
    %c0_i32 = arith.constant 0 : i32
    %c0_i32_0 = arith.constant 0 : i32
    %c0_i32_1 = arith.constant 0 : i32
    return %c0_i32, %c0_i32_0 : i32, i32
  }
  func.func @transform_7(%arg0: i32) -> (i32, i32) {
    %c0_i32 = arith.constant 0 : i32
    %c0_i32_0 = arith.constant 0 : i32
    %c0_i32_1 = arith.constant 0 : i32
    return %c0_i32, %c0_i32_0 : i32, i32
  }
  func.func @transform_8(%arg0: i32) -> (i32, i32) {
    %c0_i32 = arith.constant 0 : i32
    %c0_i32_0 = arith.constant 0 : i32
    %c0_i32_1 = arith.constant 0 : i32
    return %c0_i32, %c0_i32_0 : i32, i32
  }
  func.func @transform_9(%arg0: i32) -> (i32, i32) {
    %c0_i32 = arith.constant 0 : i32
    %c0_i32_0 = arith.constant 0 : i32
    return %arg0, %c0_i32 : i32, i32
  }
}

</mosaic_0001>

<bundles_post_ra>
// kernel: tpu_custom_call.1
= control target key start
LH: loop header
LB: loop body
LE: loop exit
PB: predicated region body
PF: predicated region fallthrough
CT: control target
= control target key end

     0   :  { %14 = vsyncpa [#allocation3], 0  ;;  %s1007_s0 = inlined_call_operand.hbm [shape: f32[8,16], index: 0, kind: input, shape index: {}]   ;;  %s1008_s1 = inlined_call_operand.hbm [shape: bf16[16,128], index: 1, kind: input, shape index: {}]   ;;  %s1009_s2 = inlined_call_operand.vmem [shape: f32[1,128], index: 2, kind: input, shape index: {}]   ;;  %s1010_s3 = inlined_call_operand.hbm [shape: bf16[128,128], index: 3, kind: input, shape index: {}]   ;;  %s1011_s4 = inlined_call_operand.vmem [shape: f32[1,128], index: 4, kind: input, shape index: {}]   ;;  %s1012_s5 = inlined_call_operand.hbm [shape: bf16[128,128], index: 5, kind: input, shape index: {}]   ;;  %s1013_s6 = inlined_call_operand.vmem [shape: f32[1,128], index: 6, kind: input, shape index: {}]   ;;  %s1014_s7 = inlined_call_operand.hbm [shape: bf16[128,128], index: 7, kind: input, shape index: {}]   ;;  %s1015_s8 = inlined_call_operand.vmem [shape: f32[1,128], index: 8, kind: input, shape index: {}]   ;;  %s1016_s9 = inlined_call_operand.hbm [shape: f32[8,128], index: 9, kind: output, shape index: {}]  }
   0x1   :  { %15 = vsyncpa [#allocation6], 0 }
   0x2   :  { %16 = vsyncpa [#allocation9], 0 }
   0x3   :  { %17 = vsyncpa [#allocation4], 0  ;;  %s818_s30 = smov [#allocation5]   ;;  %s678_s13 = scalar_lea.hbm %s1008_s1, 128 }
   0x4   :  { %s33_s10 = sshll.u32 %s818_s30, 4  ;;  %p679_p0 = scmp.ne.s32.totalorder %s1008_s1, %s678_s13  ;;  %s34_s10 = int_to_ptr.vmem [resolvable:$true] %s33_s10 }
   0x5   :  { %p682_p1 = scmp.lt.u32.totalorder %s678_s13, %s1008_s1 }
   0x7   :  { %p684_p2 = pnand %p682_p1, %p679_p0 }
   0x9   :  { %687 = shalt.err (!%p684_p2)
}
   0xa   :  { %s688_s18 = scalar_lea.vmem %s34_s10, 128  ;;  %p693_p4 = scmp.lt.s32.totalorder %s34_s10, %s34_s10 }
   0xb   :  { %p689_p3 = scmp.ne.s32.totalorder %s34_s10, %s688_s18  ;;  %p694_p5 = scmp.lt.s32.totalorder %s688_s18, %s688_s18 }
   0xd   :  { %p695_p6 = por %p694_p5, %p693_p4 }
   0xf   :  { %p696_p7 = pnand %p695_p6, %p689_p3 }
  0x11   :  { %699 = shalt.err (!%p696_p7)
}
  0x12   :  { %s819_s19 = smov 64   ;;  %s820_s20 = smov 4  }
  0x13   :  { %39 = dma.hbm_to_vmem [thread:$0]  %s1008_s1, 128, %s34_s10, [#allocation6], %s819_s19, %s819_s19, %s820_s20  }
  0x14   :  { %s821_s23 = smov [#allocation8]   ;;  %s822_s25 = smov [#allocation2]  }
  0x15   :  { %s61_s24 = sshll.u32 %s821_s23, 4  ;;  %s24_s26 = sshll.u32 %s822_s25, 4  ;;  %s62_s24 = int_to_ptr.vmem [resolvable:$true] %s61_s24  ;;  %s25_s26 = int_to_ptr.vmem [resolvable:$true] %s24_s26 }
  0x16   :  { %s700_s29 = scalar_lea.hbm %s1012_s5, 1024 }
  0x17   :  { %p701_p8 = scmp.ne.s32.totalorder %s1012_s5, %s700_s29  ;;  %p704_p9 = scmp.lt.u32.totalorder %s700_s29, %s1012_s5 }
  0x19   :  { %p706_p10 = pnand %p704_p9, %p701_p8 }
  0x1b   :  { %709 = shalt.err (!%p706_p10)
}
  0x1c   :  { %s710_s1 = scalar_lea.vmem %s62_s24, 1024  ;;  %p715_p12 = scmp.lt.s32.totalorder %s62_s24, %s62_s24 }
  0x1d   :  { %p711_p11 = scmp.ne.s32.totalorder %s62_s24, %s710_s1  ;;  %p716_p13 = scmp.lt.s32.totalorder %s710_s1, %s710_s1 }
  0x1f   :  { %p717_p0 = por %p716_p13, %p715_p12 }
  0x21   :  { %p718_p1 = pnand %p717_p0, %p711_p11 }
  0x23   :  { %721 = shalt.err (!%p718_p1)
}
  0x24   :  { %67 = dma.hbm_to_vmem [thread:$0]  %s1012_s5, 1024, %s62_s24, [#allocation9], %s819_s19, %s819_s19, %s820_s20  }
  0x25   :  { %s722_s17 = scalar_lea.hbm %s1007_s0, 128 }
  0x26   :  { %p723_p2 = scmp.ne.s32.totalorder %s1007_s0, %s722_s17  ;;  %p726_p3 = scmp.lt.u32.totalorder %s722_s17, %s1007_s0 }
  0x28   :  { %p728_p4 = pnand %p726_p3, %p723_p2 }
  0x2a   :  { %731 = shalt.err (!%p728_p4)
}
  0x2b   :  { %s732_s25 = scalar_lea.vmem %s25_s26, 128  ;;  %p737_p6 = scmp.lt.s32.totalorder %s25_s26, %s25_s26 }
  0x2c   :  { %p733_p5 = scmp.ne.s32.totalorder %s25_s26, %s732_s25  ;;  %p738_p7 = scmp.lt.s32.totalorder %s732_s25, %s732_s25 }
  0x2e   :  { %p739_p8 = por %p738_p7, %p737_p6 }
  0x30   :  { %p740_p9 = pnand %p739_p8, %p733_p5 }
  0x32   :  { %743 = shalt.err (!%p740_p9)
}
  0x33   :  { %27 = dma.hbm_to_vmem [thread:$0]  %s1007_s0, 128, %s25_s26, [#allocation3]  }
  0x34   :  { %s823_s27 = smov [#allocation7]   ;;  %s824_s29 = smov [#allocation10]  }
  0x35   :  { %s47_s28 = sshll.u32 %s823_s27, 4  ;;  %s75_s30 = sshll.u32 %s824_s29, 4  ;;  %s48_s28 = int_to_ptr.vmem [resolvable:$true] %s47_s28  ;;  %s76_s30 = int_to_ptr.vmem [resolvable:$true] %s75_s30 }
  0x36   :  { %s744_s13 = scalar_lea.hbm %s1010_s3, 1024 }
  0x37   :  { %p745_p10 = scmp.ne.s32.totalorder %s1010_s3, %s744_s13  ;;  %p748_p11 = scmp.lt.u32.totalorder %s744_s13, %s1010_s3 }
  0x39   :  { %p750_p12 = pnand %p748_p11, %p745_p10 }
  0x3b   :  { %753 = shalt.err (!%p750_p12)
}
  0x3c   :  { %s754_s0 = scalar_lea.vmem %s48_s28, 1024  ;;  %p759_p0 = scmp.lt.s32.totalorder %s48_s28, %s48_s28 }
  0x3d   :  { %p755_p13 = scmp.ne.s32.totalorder %s48_s28, %s754_s0  ;;  %p760_p1 = scmp.lt.s32.totalorder %s754_s0, %s754_s0 }
  0x3f   :  { %p761_p2 = por %p760_p1, %p759_p0 }
  0x41   :  { %p762_p3 = pnand %p761_p2, %p755_p13 }
  0x43   :  { %765 = shalt.err (!%p762_p3)
}
  0x44   :  { %53 = dma.hbm_to_vmem [thread:$0]  %s1010_s3, 1024, %s48_s28, [#allocation6], %s819_s19, %s819_s19, %s820_s20  }
  0x45   :  { %s766_s21 = scalar_lea.hbm %s1014_s7, 1024 }
  0x46   :  { %p767_p4 = scmp.ne.s32.totalorder %s1014_s7, %s766_s21  ;;  %p770_p5 = scmp.lt.u32.totalorder %s766_s21, %s1014_s7 }
  0x48   :  { %p772_p6 = pnand %p770_p5, %p767_p4 }
  0x4a   :  { %775 = shalt.err (!%p772_p6)
}
  0x4b   :  { %s776_s24 = scalar_lea.vmem %s76_s30, 1024  ;;  %p781_p8 = scmp.lt.s32.totalorder %s76_s30, %s76_s30 }
  0x4c   :  { %p777_p7 = scmp.ne.s32.totalorder %s76_s30, %s776_s24  ;;  %p782_p9 = scmp.lt.s32.totalorder %s776_s24, %s776_s24 }
  0x4e   :  { %p783_p10 = por %p782_p9, %p781_p8 }
  0x50   :  { %p784_p11 = pnand %p783_p10, %p777_p7 }
  0x52   :  { %787 = shalt.err (!%p784_p11)
}
  0x53   :  { %81 = dma.hbm_to_vmem [thread:$0]  %s1014_s7, 1024, %s76_s30, [#allocation9], %s819_s19, %s819_s19, %s820_s20  }
  0x54   :  { %810 = dma.done.wait [#allocation3], 128  }
  0x55   :  { %811 = vsyncadd [#allocation3], 4294967168 }
  0x56   :  { %812 = dma.done.wait [#allocation6], 1152  }
  0x57   :  { %813 = vsyncadd [#allocation6], 4294966144 }
  0x58   :  { %814 = dma.done.wait [#allocation9], 2048  }
  0x59   :  { %815 = vsyncadd [#allocation9], 4294965248  ;;  %v825_v0 = vmov 0.0   ;;  %vm826_vm0 = vmmov 0   ;;  %v653_v1 = vld [vmem:[#allocation5] sm:$0xff]   ;;  %v100_v2 = vld [vmem:[#allocation2] sm:$0xff] }
  0x5a   :  { %577 = vmatprep.subr.bf16.mxu0 %v825_v0  ;;  %579 = vmatprep.mubr.msk.bf16.mxu0 %vm826_vm0, %v825_v0  ;;  %v101_v3 = vpack.c.bf16 %v100_v2, %v100_v2  ;;  %vm117_vm1 = vcmask 130048   ;;  %v654_v4 = vld [vmem:[#allocation7] sm:$0xff]   ;;  %v655_v5 = vld [vmem:[#allocation7 + $0x8] sm:$0xff]   ;;  %v656_v6 = vld [vmem:[#allocation7 + $0x10] sm:$0xff]   ;;  %s827_s11 = smov [#allocation11]  }
  0x5b   :  { %583 = vmatprep.subr.bf16.mxu1 %v825_v0  ;;  %599 = vmatprep.mubr.msk.bf16.mxu1 %vm826_vm0, %v825_v0  ;;  %v657_v7 = vld [vmem:[#allocation7 + $0x18] sm:$0xff]   ;;  %v658_v8 = vld [vmem:[#allocation7 + $0x20] sm:$0xff]   ;;  %v659_v9 = vld [vmem:[#allocation7 + $0x28] sm:$0xff]   ;;  %s507_s12 = sshll.u32 %s827_s11, 4  ;;  %s508_s12 = int_to_ptr.vmem [resolvable:$true] %s507_s12 }
  0x5c   :  { %578 = vmatpush3.bf16.msra.mxu0 %v653_v1  ;;  %584 = vmatpush3.bf16.msra.mxu1 %v654_v4  ;;  %v660_v10 = vld [vmem:[#allocation7 + $0x30] sm:$0xff]   ;;  %v661_v11 = vld [vmem:[#allocation7 + $0x38] sm:$0xff]   ;;  %v662_v12 = vld [vmem:[#allocation8] sm:$0xff]   ;;  %p793_p13 = scmp.lt.s32.totalorder %s508_s12, %s508_s12 }
  0x5d   :  { %603 = vmatprep.subr.bf16.mxu0 %v825_v0  ;;  %585 = vmatprep.subr.bf16.mxu1 %v825_v0  ;;  %v663_v13 = vld [vmem:[#allocation8 + $0x8] sm:$0xff]   ;;  %v664_v14 = vld [vmem:[#allocation8 + $0x10] sm:$0xff]   ;;  %v665_v15 = vld [vmem:[#allocation8 + $0x18] sm:$0xff]  }
  0x5e   :  { %v666_v16 = vld [vmem:[#allocation8 + $0x20] sm:$0xff]   ;;  %v667_v17 = vld [vmem:[#allocation8 + $0x28] sm:$0xff]   ;;  %v518_v18 = vld [vmem:[%s1009_s2] ss:$0 sm:$0xff] }
  0x5f   :  { %580 = vmatmul.mubr.msk.bf16.vlgmr.msra.gmra.mrb[0].mxu0 %vm117_vm1, %v101_v3  ;;  %v668_v26 = vld [vmem:[#allocation8 + $0x30] sm:$0xff]   ;;  %v669_v27 = vld [vmem:[#allocation8 + $0x38] sm:$0xff]   ;;  %v670_v28 = vld [vmem:[#allocation10] sm:$0xff]  }
  0x60   :  { %619 = vmatprep.mubr.msk.bf16.mxu0 %vm826_vm0, %v825_v0  ;;  %586 = vmatpush3.bf16.msra.mxu1 %v655_v5  ;;  %v671_v29 = vld [vmem:[#allocation10 + $0x8] sm:$0xff]   ;;  %v672_v30 = vld [vmem:[#allocation10 + $0x10] sm:$0xff]   ;;  %v673_v31 = vld [vmem:[#allocation10 + $0x18] sm:$0xff]  }
  0x61   :  { %587 = vmatprep.subr.bf16.mxu1 %v825_v0  ;;  %604 = vmatpush3.bf16.msra.mxu0 %v662_v12  ;;  %v674_v32 = vld [vmem:[#allocation10 + $0x20] sm:$0xff]   ;;  %v675_v33 = vld [vmem:[#allocation10 + $0x28] sm:$0xff]   ;;  %v521_v34 = vld [vmem:[%s1011_s4] ss:$0 sm:$0xff] }
  0x62   :  { %605 = vmatprep.subr.bf16.mxu0 %v825_v0  ;;  %v676_v42 = vld [vmem:[#allocation10 + $0x30] sm:$0xff]   ;;  %v677_v43 = vld [vmem:[#allocation10 + $0x38] sm:$0xff]  }
  0x63   :  { %v530_v44 = vld [vmem:[%s1013_s6] ss:$0 sm:$0xff]  ;;  %s788_s6 = scalar_lea.vmem %s508_s12, 128 }
  0x64   :  { %588 = vmatpush3.bf16.msra.mxu1 %v656_v6  ;;  %v539_v52 = vld [vmem:[%s1015_s8] ss:$0 sm:$0xff]  ;;  %p789_p12 = scmp.ne.s32.totalorder %s508_s12, %s788_s6  ;;  %p794_p0 = scmp.lt.s32.totalorder %s788_s6, %s788_s6 }
  0x65   :  { %589 = vmatprep.subr.bf16.mxu1 %v825_v0  ;;  %606 = vmatpush3.bf16.msra.mxu0 %v663_v13 }
  0x66   :  { %607 = vmatprep.subr.bf16.mxu0 %v825_v0  ;;  %p795_p1 = por %p794_p0, %p793_p13 }
  0x68   :  { %590 = vmatpush3.bf16.msra.mxu1 %v657_v7  ;;  %p796_p2 = pnand %p795_p1, %p789_p12 }
  0x69   :  { %591 = vmatprep.subr.bf16.mxu1 %v825_v0  ;;  %608 = vmatpush3.bf16.msra.mxu0 %v664_v14 }
  0x6a   :  { %609 = vmatprep.subr.bf16.mxu0 %v825_v0 }
  0x6c   :  { %592 = vmatpush3.bf16.msra.mxu1 %v658_v8 }
  0x6d   :  { %593 = vmatprep.subr.bf16.mxu1 %v825_v0  ;;  %610 = vmatpush3.bf16.msra.mxu0 %v665_v15 }
  0x6e   :  { %611 = vmatprep.subr.bf16.mxu0 %v825_v0 }
  0x70   :  { %594 = vmatpush3.bf16.msra.mxu1 %v659_v9 }
  0x71   :  { %595 = vmatprep.subr.bf16.mxu1 %v825_v0  ;;  %612 = vmatpush3.bf16.msra.mxu0 %v666_v16 }
  0x72   :  { %613 = vmatprep.subr.bf16.mxu0 %v825_v0 }
  0x74   :  { %596 = vmatpush3.bf16.msra.mxu1 %v660_v10 }
  0x75   :  { %597 = vmatprep.subr.bf16.mxu1 %v825_v0  ;;  %614 = vmatpush3.bf16.msra.mxu0 %v667_v17 }
  0x76   :  { %615 = vmatprep.subr.bf16.mxu0 %v825_v0 }
  0x78   :  { %598 = vmatpush3.bf16.msra.mxu1 %v661_v11 }
  0x79   :  { %623 = vmatprep.subr.bf16.mxu1 %v825_v0  ;;  %616 = vmatpush3.bf16.msra.mxu0 %v668_v26 }
  0x7a   :  { %617 = vmatprep.subr.bf16.mxu0 %v825_v0 }
  0x7d   :  { %618 = vmatpush3.bf16.msra.mxu0 %v669_v27 }
 0x132   :  { %v155_v19 = vpop.f32.mrb[0].mxu0 }
 0x133   :  { %v156_v20 = vadd.f32 %v518_v18, %v155_v19  ;;  %v581_v21 = vpop.f32.mrb[1].mxu0 }
 0x134   :  { %v158_v22 = vpop.f32.mrb[2].mxu0 }
 0x135   :  { %v161_v23 = vmax.f32 %v156_v20, 0.0  ;;  %v582_v24 = vpop.f32.mrb[3].mxu0 }
 0x137   :  { %v162_v25 = vpack.c.bf16 %v161_v23, %v161_v23 }
 0x139   :  { %600 = vmatmul.mubr.bf16.vlgmr.msra.gmra.mrb[0].mxu1 %v162_v25 }
 0x13a   :  { %639 = vmatprep.mubr.msk.bf16.mxu1 %vm826_vm0, %v825_v0  ;;  %624 = vmatpush3.bf16.msra.mxu1 %v670_v28 }
 0x13b   :  { %625 = vmatprep.subr.bf16.mxu1 %v825_v0 }
 0x13e   :  { %626 = vmatpush3.bf16.msra.mxu1 %v671_v29 }
 0x13f   :  { %627 = vmatprep.subr.bf16.mxu1 %v825_v0 }
 0x142   :  { %628 = vmatpush3.bf16.msra.mxu1 %v672_v30 }
 0x143   :  { %629 = vmatprep.subr.bf16.mxu1 %v825_v0 }
 0x146   :  { %630 = vmatpush3.bf16.msra.mxu1 %v673_v31 }
 0x147   :  { %631 = vmatprep.subr.bf16.mxu1 %v825_v0 }
 0x14a   :  { %632 = vmatpush3.bf16.msra.mxu1 %v674_v32 }
 0x14b   :  { %633 = vmatprep.subr.bf16.mxu1 %v825_v0 }
 0x14e   :  { %634 = vmatpush3.bf16.msra.mxu1 %v675_v33 }
 0x14f   :  { %635 = vmatprep.subr.bf16.mxu1 %v825_v0 }
 0x152   :  { %636 = vmatpush3.bf16.msra.mxu1 %v676_v42 }
 0x153   :  { %637 = vmatprep.subr.bf16.mxu1 %v825_v0 }
 0x156   :  { %638 = vmatpush3.bf16.msra.mxu1 %v677_v43 }
 0x20c   :  { %v268_v35 = vpop.f32.mrb[0].mxu1 }
 0x20d   :  { %v269_v36 = vadd.f32 %v521_v34, %v268_v35  ;;  %v601_v37 = vpop.f32.mrb[1].mxu1 }
 0x20e   :  { %v271_v38 = vpop.f32.mrb[2].mxu1 }
 0x20f   :  { %v274_v39 = vmax.f32 %v269_v36, 0.0  ;;  %v602_v40 = vpop.f32.mrb[3].mxu1 }
 0x211   :  { %v275_v41 = vpack.c.bf16 %v274_v39, %v274_v39 }
 0x213   :  { %620 = vmatmul.mubr.bf16.vlgmr.msra.gmra.mrb[4].mxu0 %v275_v41 }
 0x2e6   :  { %v381_v45 = vpop.f32.mrb[4].mxu0 }
 0x2e7   :  { %v382_v46 = vadd.f32 %v530_v44, %v381_v45  ;;  %v621_v47 = vpop.f32.mrb[5].mxu0 }
 0x2e8   :  { %v384_v48 = vpop.f32.mrb[6].mxu0 }
 0x2e9   :  { %v387_v49 = vmax.f32 %v382_v46, 0.0  ;;  %v622_v50 = vpop.f32.mrb[7].mxu0 }
 0x2eb   :  { %v388_v51 = vpack.c.bf16 %v387_v49, %v387_v49 }
 0x2ed   :  { %640 = vmatmul.mubr.bf16.vlgmr.msra.gmra.mrb[4].mxu1 %v388_v51 }
 0x3c0   :  { %v494_v53 = vpop.f32.mrb[4].mxu1 }
 0x3c1   :  { %v495_v54 = vadd.f32 %v539_v52, %v494_v53  ;;  %v641_v55 = vpop.f32.mrb[5].mxu1 }
 0x3c2   :  { %v497_v56 = vpop.f32.mrb[6].mxu1 }
 0x3c3   :  { %500 = vst [vmem:[#allocation11] sm:$0xff] %v495_v54  ;;  %v642_v57 = vpop.f32.mrb[7].mxu1 }
 0x3c4   :  { %799 = shalt.err (!%p796_p2)
}
 0x3c5   :  { %s800_s8 = scalar_lea.hbm %s1016_s9, 128 }
 0x3c6   :  { %p801_p3 = scmp.ne.s32.totalorder %s1016_s9, %s800_s8  ;;  %p804_p4 = scmp.lt.u32.totalorder %s800_s8, %s1016_s9 }
 0x3c8   :  { %p806_p5 = pnand %p804_p4, %p801_p3 }
 0x3ca   :  { %809 = shalt.err (!%p806_p5)
}
 0x3cb   :  { %510 = dma.vmem_to_hbm [thread:$0]  %s508_s12, 128, %s1016_s9, [#allocation4]  }
 0x3cc   :  { %816 = dma.done.wait [#allocation4], 128  }
 0x3cd   :  { %817 = vsyncadd [#allocation4], 4294967168 }
 0x3ce   :  { %514 = vsyncpa [#allocation3], 1 }
 0x3cf   :  { %515 = vsyncpa [#allocation6], 1 }
 0x3d0   :  { %516 = vsyncpa [#allocation9], 1 }
 0x3d1   :  { %517 = vsyncpa [#allocation4], 1 }

</bundles_post_ra>
